<compile_context>
chip_gen: v6e
topology: v6e:2x2x1
jax: 0.10.0
libtpu: 0.0.40
codegen_flags: <defaults>
</compile_context>

<pallas_src>
import math

import jax
import jax.numpy as jnp
from jax.experimental import pallas as pl
from jax.experimental.pallas import tpu as pltpu

QMAX = 127.0  # int8 narrow-range bound used by pytorch-quantization (num_bits=8)


def _fake_quant(x, scale):
    return jnp.clip(jnp.round(x / scale), -QMAX, QMAX) * scale


def _round_up(a, b):
    return -(-a // b) * b


# --------------------------- Pallas kernels ---------------------------------

def _qconv_matmul_kernel(scale_ref, w_ref, p_ref, y_ref, amax_ref):
    """Transposed conv-as-matmul on pre-quantized integer (bf16) operands.

    w_ref:     (O, K)  bf16 integer-valued quantized weight
    p_ref:     (K, TM) bf16 integer-valued quantized im2col patches (transposed)
    scale_ref: (O, 1)  f32  combined per-output-channel scale  xs * ws[o]
    y_ref:     (O, TM) f32  rescaled GEMM output (lane-dense tile)
    amax_ref:  (8,128) f32  per-tile |y| max (broadcast), reduced to o_scale in JAX
    """
    acc = jnp.dot(w_ref[...], p_ref[...], preferred_element_type=jnp.float32)  # (O, TM)
    yf = acc * scale_ref[...]                       # (O,1) broadcast over lanes
    y_ref[...] = yf
    m = jnp.max(jnp.abs(yf), axis=1, keepdims=True)  # lane reduce -> (O, 1)
    m = jnp.max(m, axis=0, keepdims=True)            # sublane reduce -> (1, 1)
    amax_ref[...] = jnp.broadcast_to(m, amax_ref.shape)


def _aftergemm_bias_kernel(o_scale_ref, y_ref, b_ref, out_ref):
    """Per-tensor fake-quant of the GEMM output + bias add, on (O, TM) lane-dense tiles.
    Writes y in place (input_output_aliases)."""
    s = o_scale_ref[0]                               # scalar (SMEM)
    yq = jnp.clip(jnp.round(y_ref[...] / s), -QMAX, QMAX) * s
    out_ref[...] = yq + b_ref[...]                   # (O, 1) bias, lane broadcast


# ------------------------------ wrapper --------------------------------------

def quantized_conv2d(x, weight, bias, stride, padding, dilation):
    """x: (N, C, H, W) f32, weight: (O, C, KH, KW) f32, bias: (O, 1, 1) f32 or None.
    Returns (N, O, OH, OW) f32 (NCHW, like PyTorch)."""
    N, C, H, W = x.shape
    O, _, KH, KW = weight.shape
    sh, sw = stride
    ph, pw = padding
    dh, dw = dilation
    OH = (H + 2 * ph - dh * (KH - 1) - 1) // sh + 1
    OW = (W + 2 * pw - dw * (KW - 1) - 1) // sw + 1

    # ---- dynamic "max" calibration scales (cheap JAX reductions) ----
    x_amax = jnp.max(jnp.abs(x))
    xs = jnp.where(x_amax > 0, x_amax / QMAX, 1.0).astype(jnp.float32)          # scalar
    w_amax = jnp.max(jnp.abs(weight), axis=(1, 2, 3))                            # (O,)
    ws = jnp.where(w_amax > 0, w_amax / QMAX, 1.0).astype(jnp.float32)           # (O,)

    # ---- hoisted fake-quant: integer values, exact in bf16 (|v| <= 127) ----
    xq_int = jnp.clip(jnp.round(x / xs), -QMAX, QMAX).astype(jnp.bfloat16)
    wq_int = jnp.clip(jnp.round(weight / ws[:, None, None, None]),
                      -QMAX, QMAX).astype(jnp.bfloat16)
    # combined per-output-channel rescale for the f32 accumulator
    sc = (xs * ws).reshape(O, 1).astype(jnp.float32)

    # ---- im2col on the compact bf16 integer data, built directly as (K, M) ----
    # (padding zeros are integer 0, so quantize-then-pad == pad-then-quantize)
    xp = jnp.pad(xq_int, ((0, 0), (0, 0), (ph, ph), (pw, pw)))
    cols = []
    for kh in range(KH):
        for kw in range(KW):
            cols.append(xp[:, :,
                           kh * dh: kh * dh + sh * (OH - 1) + 1: sh,
                           kw * dw: kw * dw + sw * (OW - 1) + 1: sw])  # (N, C, OH, OW)
    patches = jnp.stack(cols, axis=2)                       # (N, C, KH*KW, OH, OW)
    # K-order (C, KH, KW) matches weight.reshape(O, C*KH*KW); M-order (N, OH, OW)
    patches_t = patches.transpose(1, 2, 0, 3, 4).reshape(C * KH * KW, N * OH * OW)
    w2 = wq_int.reshape(O, C * KH * KW)                     # (O, K) bf16

    M = N * OH * OW
    K = C * KH * KW
    # Large lane-dense tiles: whole problem in one grid step when it fits.
    # (For very large K/M, K should be grid-tiled with an "arbitrary" reduction axis.)
    TM = min(1024, _round_up(M, 128))
    Mp = _round_up(M, TM)
    if Mp != M:
        patches_t = jnp.pad(patches_t, ((0, 0), (0, Mp - M)))
    num_tiles = Mp // TM

    # ---- Pallas kernel 1: bf16 MXU matmul + per-channel rescale + per-tile amax ----
    y, amax_part = pl.pallas_call(
        _qconv_matmul_kernel,
        out_shape=(jax.ShapeDtypeStruct((O, Mp), jnp.float32),
                   jax.ShapeDtypeStruct((num_tiles * 8, 128), jnp.float32)),
        grid_spec=pltpu.PrefetchScalarGridSpec(
            num_scalar_prefetch=0,
            grid=(num_tiles,),
            in_specs=[
                pl.BlockSpec((O, 1), lambda i: (0, 0)),     # combined scales (O,1)
                pl.BlockSpec((O, K), lambda i: (0, 0)),     # quantized weight (resident)
                pl.BlockSpec((K, TM), lambda i: (0, i)),    # patches^T tile (lane-dense)
            ],
            out_specs=[
                pl.BlockSpec((O, TM), lambda i: (0, i)),    # y^T tile (lane-dense)
                pl.BlockSpec((8, 128), lambda i: (i, 0)),   # per-tile amax slab
            ],
        ),
        compiler_params=pltpu.CompilerParams(dimension_semantics=("parallel",)),
    )(sc, w2, patches_t)

    # ---- after-gemm per-tensor scale from the tiny per-tile amax output ----
    # (padded columns produce exact zeros, so they never affect the max)
    o_amax = jnp.max(amax_part)
    o_scale = jnp.where(o_amax > 0, o_amax / QMAX, 1.0).reshape(1).astype(jnp.float32)

    if bias is None:
        b2 = jnp.zeros((O, 1), jnp.float32)
    else:
        b2 = bias.reshape(O, 1).astype(jnp.float32)

    # ---- Pallas kernel 2: after-gemm fake-quant + bias add, in place over y ----
    out_t = pl.pallas_call(
        _aftergemm_bias_kernel,
        out_shape=jax.ShapeDtypeStruct((O, Mp), jnp.float32),
        grid_spec=pltpu.PrefetchScalarGridSpec(
            num_scalar_prefetch=0,
            grid=(num_tiles,),
            in_specs=[
                pl.BlockSpec(memory_space=pltpu.MemorySpace.SMEM),  # o_scale (1,)
                pl.BlockSpec((O, TM), lambda i: (0, i)),            # y^T tile
                pl.BlockSpec((O, 1), lambda i: (0, 0)),             # bias column
            ],
            out_specs=pl.BlockSpec((O, TM), lambda i: (0, i)),
        ),
        input_output_aliases={1: 0},   # write the result in place over y
        compiler_params=pltpu.CompilerParams(dimension_semantics=("parallel",)),
    )(o_scale, y, b2)

    # (O, M) -> NCHW
    return out_t[:, :M].reshape(O, N, OH, OW).transpose(1, 0, 2, 3)


# --------------------------- pure-JAX reference -------------------------------

def _reference(x, weight, bias, stride, padding, dilation):
    x_amax = jnp.max(jnp.abs(x))
    xsc = jnp.where(x_amax > 0, x_amax / QMAX, 1.0)
    xq = _fake_quant(x, xsc)
    w_amax = jnp.max(jnp.abs(weight), axis=(1, 2, 3), keepdims=True)
    wsc = jnp.where(w_amax > 0, w_amax / QMAX, 1.0)
    wq = _fake_quant(weight, wsc)
    y = jax.lax.conv_general_dilated(
        xq, wq, window_strides=stride,
        padding=[(padding[0], padding[0]), (padding[1], padding[1])],
        rhs_dilation=dilation,
        dimension_numbers=("NCHW", "OIHW", "NCHW"))
    o_amax = jnp.max(jnp.abs(y))
    osc = jnp.where(o_amax > 0, o_amax / QMAX, 1.0)
    yq = _fake_quant(y, osc)
    return yq + bias.reshape(1, -1, 1, 1), osc


if __name__ == "__main__":
    key = jax.random.PRNGKey(0)
    k_w, k_b, k_x = jax.random.split(key, 3)

    # module config: QuantizedConv2d(4, 8, kernel_size=(3,3), stride=(1,1), padding=1, bias=True)
    N, C, H, W = 2, 4, 16, 16
    O, KH, KW = 8, 3, 3
    stride, padding, dilation = (1, 1), (1, 1), (1, 1)

    # deterministic param init mirroring reset_parameters():
    #   kaiming_normal_(weight, a=sqrt(5));  bias ~ U(-1/sqrt(fan_in), 1/sqrt(fan_in))
    fan_in = C * KH * KW
    gain = math.sqrt(2.0 / (1.0 + 5.0))
    std = gain / math.sqrt(fan_in)
    weight = (std * jax.random.normal(k_w, (O, C, KH, KW))).astype(jnp.float32)
    bound = 1.0 / math.sqrt(fan_in)
    bias = jax.random.uniform(k_b, (O, 1, 1), minval=-bound, maxval=bound).astype(jnp.float32)

    x = jax.random.normal(k_x, (N, C, H, W), dtype=jnp.float32)

    fwd = jax.jit(lambda xx, ww, bb: quantized_conv2d(xx, ww, bb, stride, padding, dilation))
    out = fwd(x, weight, bias)
    out = jax.block_until_ready(out)

    ref, o_scale = _reference(x, weight, bias, stride, padding, dilation)
    assert out.shape == (N, O, H, W), out.shape
    # tolerate at most ~one quantization step (possible round() boundary flips)
    atol = 1.5 * float(o_scale) + 1e-5
    assert jnp.allclose(out, ref, rtol=0.0, atol=atol), "mismatch vs pure-JAX reference"
    print("KERNEL_OK")
</pallas_src>

<mosaic_0001>
module attributes {stable_mosaic.version = 11 : i64} {
  func.func @_qconv_matmul_kernel(%arg0: i32, %arg1: memref<8x1xf32, #tpu.memory_space<vmem>>, %arg2: memref<8x36xbf16, #tpu.memory_space<vmem>>, %arg3: memref<36x512xbf16, #tpu.memory_space<vmem>>, %arg4: memref<8x512xf32, #tpu.memory_space<vmem>>, %arg5: memref<8x128xf32, #tpu.memory_space<vmem>>) attributes {dimension_semantics = [#tpu.dimension_semantics<parallel>], iteration_bounds = array<i64: 1>, scalar_prefetch = 0 : i64, scratch_operands = 0 : i64, tpu.core_type = #tpu.core_type<tc>, window_params = [{pipeline_mode = #tpu.pipeline_mode<synchronous>, transform_indices = @transform_0, window_bounds = array<i64: 8, 1>}, {pipeline_mode = #tpu.pipeline_mode<synchronous>, transform_indices = @transform_1, window_bounds = array<i64: 8, 36>}, {transform_indices = @transform_2, window_bounds = array<i64: 36, 512>}, {transform_indices = @transform_3, window_bounds = array<i64: 8, 512>}, {transform_indices = @transform_4, window_bounds = array<i64: 8, 128>}]} {
    %c0 = arith.constant 0 : index
    %c0_0 = arith.constant 0 : index
    %0 = vector.load %arg2[%c0, %c0_0] : memref<8x36xbf16, #tpu.memory_space<vmem>>, vector<8x36xbf16>
    %c0_1 = arith.constant 0 : index
    %c0_2 = arith.constant 0 : index
    %1 = vector.load %arg3[%c0_1, %c0_2] : memref<36x512xbf16, #tpu.memory_space<vmem>>, vector<36x512xbf16>
    %cst = arith.constant dense<0.000000e+00> : vector<8x512xf32>
    %2 = tpu.matmul %0, %1, %cst {dimension_numbers = #tpu.dot_dimension_numbers<[1], [0], [0], [1], [0, 0, 1, 1], [], []>} : vector<8x36xbf16>, vector<36x512xbf16>, vector<8x512xf32> -> vector<8x512xf32>
    %c0_3 = arith.constant 0 : index
    %c0_4 = arith.constant 0 : index
    %3 = vector.load %arg1[%c0_3, %c0_4] : memref<8x1xf32, #tpu.memory_space<vmem>>, vector<8x1xf32>
    %4 = vector.broadcast %3 : vector<8x1xf32> to vector<8x512xf32>
    %5 = arith.mulf %2, %4 : vector<8x512xf32>
    %c0_5 = arith.constant 0 : index
    %c0_6 = arith.constant 0 : index
    %6 = vector.load %arg4[%c0_5, %c0_6] : memref<8x512xf32, #tpu.memory_space<vmem>>, vector<8x512xf32>
    tpu.vector_store %arg4[%c0_5, %c0_6], %5 {strides = array<i32>} : memref<8x512xf32, #tpu.memory_space<vmem>>, vector<8x512xf32>,
    %7 = math.absf %5 : vector<8x512xf32>
    %cst_7 = arith.constant dense<0xFF800000> : vector<8xf32>
    %8 = vector.multi_reduction <maximumf>, %7, %cst_7 [1] : vector<8x512xf32> to vector<8xf32>
    %9 = vector.shape_cast %8 : vector<8xf32> to vector<8x1xf32>
    %cst_8 = arith.constant dense<0xFF800000> : vector<1xf32>
    %10 = vector.multi_reduction <maximumf>, %9, %cst_8 [0] : vector<8x1xf32> to vector<1xf32>
    %11 = vector.shape_cast %10 : vector<1xf32> to vector<1x1xf32>
    %12 = vector.shape_cast %11 : vector<1x1xf32> to vector<1x1xf32>
    %13 = vector.broadcast %12 : vector<1x1xf32> to vector<8x128xf32>
    %c0_9 = arith.constant 0 : index
    %c0_10 = arith.constant 0 : index
    %14 = vector.load %arg5[%c0_9, %c0_10] : memref<8x128xf32, #tpu.memory_space<vmem>>, vector<8x128xf32>
    tpu.vector_store %arg5[%c0_9, %c0_10], %13 {strides = array<i32>} : memref<8x128xf32, #tpu.memory_space<vmem>>, vector<8x128xf32>,
    return
  }
  func.func @transform_0(%arg0: i32) -> (i32, i32) {
    %c0_i32 = arith.constant 0 : i32
    %c0_i32_0 = arith.constant 0 : i32
    %c0_i32_1 = arith.constant 0 : i32
    return %c0_i32, %c0_i32_0 : i32, i32
  }
  func.func @transform_1(%arg0: i32) -> (i32, i32) {
    %c0_i32 = arith.constant 0 : i32
    %c0_i32_0 = arith.constant 0 : i32
    %c0_i32_1 = arith.constant 0 : i32
    return %c0_i32, %c0_i32_0 : i32, i32
  }
  func.func @transform_2(%arg0: i32) -> (i32, i32) {
    %c0_i32 = arith.constant 0 : i32
    %c0_i32_0 = arith.constant 0 : i32
    return %c0_i32, %arg0 : i32, i32
  }
  func.func @transform_3(%arg0: i32) -> (i32, i32) {
    %c0_i32 = arith.constant 0 : i32
    %c0_i32_0 = arith.constant 0 : i32
    return %c0_i32, %arg0 : i32, i32
  }
  func.func @transform_4(%arg0: i32) -> (i32, i32) {
    %c0_i32 = arith.constant 0 : i32
    %c0_i32_0 = arith.constant 0 : i32
    return %arg0, %c0_i32 : i32, i32
  }
}

module attributes {stable_mosaic.version = 11 : i64} {
  func.func @_aftergemm_bias_kernel(%arg0: i32, %arg1: memref<1xf32, #tpu.memory_space<smem>>, %arg2: memref<8x512xf32, #tpu.memory_space<vmem>>, %arg3: memref<8x1xf32, #tpu.memory_space<vmem>>, %arg4: memref<8x512xf32, #tpu.memory_space<vmem>>) attributes {dimension_semantics = [#tpu.dimension_semantics<parallel>], iteration_bounds = array<i64: 1>, scalar_prefetch = 0 : i64, scratch_operands = 0 : i64, tpu.core_type = #tpu.core_type<tc>, window_params = [{transform_indices = @transform_0, window_bounds = array<i64: 1>}, {transform_indices = @transform_1, window_bounds = array<i64: 8, 512>}, {pipeline_mode = #tpu.pipeline_mode<synchronous>, transform_indices = @transform_2, window_bounds = array<i64: 8, 1>}, {transform_indices = @transform_3, window_bounds = array<i64: 8, 512>}]} {
    %c0 = arith.constant 0 : index
    %0 = memref.load %arg1[%c0] : memref<1xf32, #tpu.memory_space<smem>>
    %c0_0 = arith.constant 0 : index
    %c0_1 = arith.constant 0 : index
    %1 = vector.load %arg2[%c0_0, %c0_1] : memref<8x512xf32, #tpu.memory_space<vmem>>, vector<8x512xf32>
    %2 = vector.broadcast %0 : f32 to vector<8x512xf32>
    %3 = arith.divf %1, %2 : vector<8x512xf32>
    %4 = math.roundeven %3 : vector<8x512xf32>
    %cst = arith.constant -1.270000e+02 : f32
    %cst_2 = arith.constant 1.270000e+02 : f32
    %5 = vector.broadcast %cst : f32 to vector<8x512xf32>
    %6 = arith.maximumf %5, %4 : vector<8x512xf32>
    %7 = vector.broadcast %cst_2 : f32 to vector<8x512xf32>
    %8 = arith.minimumf %7, %6 : vector<8x512xf32>
    %9 = vector.broadcast %0 : f32 to vector<8x512xf32>
    %10 = arith.mulf %8, %9 : vector<8x512xf32>
    %c0_3 = arith.constant 0 : index
    %c0_4 = arith.constant 0 : index
    %11 = vector.load %arg3[%c0_3, %c0_4] : memref<8x1xf32, #tpu.memory_space<vmem>>, vector<8x1xf32>
    %12 = vector.broadcast %11 : vector<8x1xf32> to vector<8x512xf32>
    %13 = arith.addf %10, %12 : vector<8x512xf32>
    %c0_5 = arith.constant 0 : index
    %c0_6 = arith.constant 0 : index
    %14 = vector.load %arg4[%c0_5, %c0_6] : memref<8x512xf32, #tpu.memory_space<vmem>>, vector<8x512xf32>
    tpu.vector_store %arg4[%c0_5, %c0_6], %13 {strides = array<i32>} : memref<8x512xf32, #tpu.memory_space<vmem>>, vector<8x512xf32>,
    return
  }
  func.func @transform_0(%arg0: i32) -> i32 {
    %c0_i32 = arith.constant 0 : i32
    %c0_i32_0 = arith.constant 0 : i32
    return %c0_i32 : i32
  }
  func.func @transform_1(%arg0: i32) -> (i32, i32) {
    %c0_i32 = arith.constant 0 : i32
    %c0_i32_0 = arith.constant 0 : i32
    return %c0_i32, %arg0 : i32, i32
  }
  func.func @transform_2(%arg0: i32) -> (i32, i32) {
    %c0_i32 = arith.constant 0 : i32
    %c0_i32_0 = arith.constant 0 : i32
    %c0_i32_1 = arith.constant 0 : i32
    return %c0_i32, %c0_i32_0 : i32, i32
  }
  func.func @transform_3(%arg0: i32) -> (i32, i32) {
    %c0_i32 = arith.constant 0 : i32
    %c0_i32_0 = arith.constant 0 : i32
    return %c0_i32, %arg0 : i32, i32
  }
}

</mosaic_0001>

<bundles_post_ra>
// kernel: _lambda_.3
= control target key start
LH: loop header
LB: loop body
LE: loop exit
PB: predicated region body
PF: predicated region fallthrough
CT: control target
= control target key end

     0   :  { %v100_v0 = vmov 0   ;;  %s151_s2 = inlined_call_operand.vmem [shape: f32[8,1], index: 2, kind: input, shape index: {}]   ;;  %s152_s0 = inlined_call_operand.<no memory space> [shape: f32[1], index: 0, kind: input, shape index: {}]   ;;  %s153_s1 = inlined_call_operand.vmem [shape: f32[8,512], index: 1, kind: input, shape index: {}, may-alias: {1,3}]   ;;  %s154_s3 = inlined_call_operand.vmem [shape: f32[8,512], index: 3, kind: output, shape index: {}, may-alias: {1,3}]  }
   0x1   :  { %97 = vset.pattern.permute.xlu0 %v100_v0  ;;  %v42_v1 = vld [vmem:[%s151_s2] sm:$0xff]  ;;  %v20_v2 = vstv %s152_s0  ;;  %v17_v5 = vld [vmem:[%s153_s1 + $0x8] sm:$0xff]  ;;  %v18_v6 = vld [vmem:[%s153_s1 + $0x10] sm:$0xff] }
   0x2   :  { %45 = vperm.xlu0 %97, %v42_v1   ;;  %98 = vrcp.f32 %v20_v2  ;;  %v16_v4 = vld [vmem:[%s153_s1] sm:$0xff]  ;;  %v19_v7 = vld [vmem:[%s153_s1 + $0x18] sm:$0xff] }
   0xf   :  { %v99_v3 = vpop.eup %98 }
  0x10   :  { %v22_v8 = vmul.f32 %v99_v3, %v16_v4  ;;  %v23_v9 = vmul.f32 %v99_v3, %v17_v5  ;;  %v24_v10 = vmul.f32 %v99_v3, %v18_v6  ;;  %v25_v11 = vmul.f32 %v99_v3, %v19_v7 }
  0x12   :  { %v66_v12 = vcvt.f32.s32 %v22_v8  ;;  %v74_v13 = vcvt.f32.s32 %v23_v9  ;;  %v82_v14 = vcvt.f32.s32 %v24_v10  ;;  %v90_v15 = vcvt.f32.s32 %v25_v11 }
  0x13   :  { %v64_v20 = vand.u32 2147483647, %v22_v8  ;;  %v69_v21 = vand.u32 2147483648, %v22_v8  ;;  %v77_v23 = vand.u32 2147483648, %v23_v9  ;;  %v85_v24 = vand.u32 2147483648, %v24_v10 }
  0x14   :  { %v67_v16 = vcvt.s32.f32 %v66_v12  ;;  %v75_v17 = vcvt.s32.f32 %v74_v13  ;;  %v83_v18 = vcvt.s32.f32 %v82_v14  ;;  %v91_v19 = vcvt.s32.f32 %v90_v15 }
  0x15   :  { %v93_v25 = vand.u32 2147483648, %v25_v11  ;;  %v72_v29 = vand.u32 2147483647, %v23_v9  ;;  %v80_v30 = vand.u32 2147483647, %v24_v10  ;;  %vm65_vm0 = vcmp.lt.f32.partialorder %v64_v20, 8388608.0 }
  0x16   :  { %v68_v22 = vand.u32 2147483647, %v67_v16  ;;  %v76_v26 = vand.u32 2147483647, %v75_v17  ;;  %v84_v27 = vand.u32 2147483647, %v83_v18 }
  0x17   :  { %v92_v28 = vand.u32 2147483647, %v91_v19  ;;  %v88_v31 = vand.u32 2147483647, %v25_v11  ;;  %vm73_vm1 = vcmp.lt.f32.partialorder %v72_v29, 8388608.0  ;;  %vm81_vm2 = vcmp.lt.f32.partialorder %v80_v30, 8388608.0 }
  0x18   :  { %v70_v32 = vor.u32 %v69_v21, %v68_v22  ;;  %v78_v33 = vor.u32 %v77_v23, %v76_v26  ;;  %v86_v34 = vor.u32 %v85_v24, %v84_v27 }
  0x19   :  { %v94_v35 = vor.u32 %v93_v25, %v92_v28  ;;  %vm89_vm3 = vcmp.lt.f32.partialorder %v88_v31, 8388608.0 }
  0x1a   :  { %v71_v36 = vsel %vm65_vm0, %v70_v32, %v22_v8  ;;  %v79_v37 = vsel %vm73_vm1, %v78_v33, %v23_v9  ;;  %v87_v38 = vsel %vm81_vm2, %v86_v34, %v24_v10 }
  0x1b   :  { %v95_v39 = vsel %vm89_vm3, %v94_v35, %v25_v11  ;;  %v60_v40 = vclamps-f32 %v71_v36, 127.0  ;;  %v61_v41 = vclamps-f32 %v79_v37, 127.0  ;;  %v62_v42 = vclamps-f32 %v87_v38, 127.0 }
  0x1c   :  { %v63_v43 = vclamps-f32 %v95_v39, 127.0 }
  0x1d   :  { %v38_v44 = vmul.f32 %v60_v40, %v20_v2  ;;  %v39_v45 = vmul.f32 %v61_v41, %v20_v2  ;;  %v40_v46 = vmul.f32 %v62_v42, %v20_v2 }
  0x1e   :  { %v41_v47 = vmul.f32 %v63_v43, %v20_v2 }
  0x7d   :  { %v46_v48 = vpop.permute.xlu0 %45 }
  0x7e   :  { %v48_v49 = vadd.f32 %v46_v48, %v38_v44  ;;  %v49_v50 = vadd.f32 %v46_v48, %v39_v45  ;;  %v50_v51 = vadd.f32 %v46_v48, %v40_v46  ;;  %v51_v52 = vadd.f32 %v46_v48, %v41_v47 }
  0x80   :  { %52 = vst [vmem:[%s154_s3] sm:$0xff] %v48_v49  ;;  %53 = vst [vmem:[%s154_s3 + $0x8] sm:$0xff] %v49_v50 }
  0x81   :  { %54 = vst [vmem:[%s154_s3 + $0x10] sm:$0xff] %v50_v51  ;;  %55 = vst [vmem:[%s154_s3 + $0x18] sm:$0xff] %v51_v52 }

// kernel: _lambda_.2
= control target key start
LH: loop header
LB: loop body
LE: loop exit
PB: predicated region body
PF: predicated region fallthrough
CT: control target
= control target key end

     0   :  { %vm82_vm0 = vcmask 1041408   ;;  %v249_v2 = vmov 0   ;;  %vm78_vm1 = vcmask 293888   ;;  %s326_s2 = inlined_call_operand.vmem [shape: bf16[36,512], index: 2, kind: input, shape index: {}]   ;;  %s327_s0 = inlined_call_operand.vmem [shape: f32[8,1], index: 0, kind: input, shape index: {}]   ;;  %s328_s1 = inlined_call_operand.vmem [shape: bf16[8,36], index: 1, kind: input, shape index: {}]   ;;  %s329_s3 = inlined_call_operand.vmem [shape: f32[8,512], index: 3, kind: output, shape index: {0}]   ;;  %s330_s4 = inlined_call_operand.vmem [shape: f32[8,128], index: 4, kind: output, shape index: {1}]  }
   0x1   :  { %v26_v0 = vld [vmem:[%s326_s2 + $0x40] sm:$0x33]  ;;  %v27_v1 = vld [vmem:[%s326_s2 + $0x48] sm:$0x33]  ;;  %127 = vmatprep.mubr.bf16.mxu0 %v249_v2  ;;  %168 = vmatprep.mubr.bf16.mxu1 %v249_v2 }
   0x2   :  { %v224_v3 = vcombine.high %v26_v0, %v26_v0  ;;  %v226_v4 = vcombine.high %v27_v1, %v27_v1  ;;  %v223_v5 = vcombine.low %v26_v0, %v26_v0  ;;  %v225_v6 = vcombine.low %v27_v1, %v27_v1  ;;  %v237_v7 = vld [vmem:[%s326_s2 + $0x24] ss:$16 sps:$4 sm:$0xff]   ;;  %232 = vset.pattern.permute.xlu0 %v249_v2  ;;  %v239_v8 = vld [vmem:[%s326_s2 + $0x2c] ss:$16 sps:$4 sm:$0xff]   ;;  %v241_v11 = vld [vmem:[%s326_s2 + $0x20] ss:$16 sps:$4 sm:$0xff]  }
   0x3   :  { %v242_v12 = vld [vmem:[%s326_s2 + $0x28] ss:$16 sps:$4 sm:$0xff]   ;;  %v243_v13 = vld [vmem:[%s326_s2 + $0x4] ss:$16 sps:$4 sm:$0xff]   ;;  %v245_v14 = vld [vmem:[%s326_s2 + $0xc] ss:$16 sps:$4 sm:$0xff]  }
   0x4   :  { %227 = vmatprep.subr.msk.bf16.mxu0 %vm82_vm0, %v224_v3  ;;  %229 = vmatprep.subr.msk.bf16.mxu1 %vm82_vm0, %v226_v4  ;;  %v84_v9 = vsel %vm82_vm0, %v223_v5, 0  ;;  %v90_v10 = vsel %vm82_vm0, %v225_v6, 0  ;;  %v177_v15 = vld [vmem:[%s327_s0] sm:$0xff]  ;;  %v248_v17 = vld [vmem:[%s326_s2 + $0x8] ss:$16 sps:$4 sm:$0xff]  }
   0x5   :  { %106 = vmatpush1.bf16.msra.mxu0 %v84_v9  ;;  %147 = vmatpush1.bf16.msra.mxu1 %v90_v10  ;;  %v247_v16 = vld [vmem:[%s326_s2] ss:$16 sps:$4 sm:$0xff]  }
   0x6   :  { %107 = vmatprep.subr.bf16.mxu0 %v237_v7  ;;  %148 = vmatprep.subr.bf16.mxu1 %v239_v8  ;;  %v17_v18 = vld [vmem:[%s328_s1] sm:$0xf] }
   0x7   :  { %180 = vperm.xlu0 %232, %v177_v15  }
   0x9   :  { %108 = vmatpush1.bf16.msra.mxu0 %v241_v11  ;;  %149 = vmatpush1.bf16.msra.mxu1 %v242_v12 }
   0xa   :  { %109 = vmatprep.subr.bf16.mxu0 %v243_v13  ;;  %150 = vmatprep.subr.bf16.mxu1 %v245_v14 }
   0xd   :  { %110 = vmatpush1.bf16.msra.mxu0 %v247_v16  ;;  %151 = vmatpush1.bf16.msra.mxu1 %v248_v17 }
  0x10   :  { %228 = vmatmul.mubr.msk.bf16.vlgmr.msra.gmra.mxu0 %vm78_vm1, %v17_v18  ;;  %230 = vmatmul.mubr.msk.bf16.vlgmr.msra.gmra.mxu1 %vm78_vm1, %v17_v18 }
  0x82   :  { %v181_v19 = vpop.permute.xlu0 %180 }
  0xd0   :  { %v129_v20 = vpop.f32.mrf.mxu0  ;;  %v170_v21 = vpop.f32.mrf.mxu1 }
  0xd1   :  { %v183_v22 = vmul.f32 %v181_v19, %v129_v20  ;;  %v185_v23 = vmul.f32 %v181_v19, %v170_v21 }
  0xd2   :  { %v131_v24 = vpop.f32.mrf.mxu0  ;;  %v172_v25 = vpop.f32.mrf.mxu1 }
  0xd3   :  { %v184_v26 = vmul.f32 %v181_v19, %v131_v24  ;;  %187 = vst [vmem:[%s329_s3] sm:$0xff] %v183_v22  ;;  %189 = vst [vmem:[%s329_s3 + $0x10] sm:$0xff] %v185_v23  ;;  %v186_v27 = vmul.f32 %v181_v19, %v172_v25  ;;  %v191_v30 = vand.u32 2147483647, %v183_v22  ;;  %v193_v33 = vand.u32 2147483647, %v185_v23 }
  0xd4   :  { %v133_v28 = vpop.f32.mrf.mxu0  ;;  %v174_v29 = vpop.f32.mrf.mxu1 }
  0xd5   :  { %188 = vst [vmem:[%s329_s3 + $0x8] sm:$0xff] %v184_v26  ;;  %v192_v31 = vand.u32 2147483647, %v184_v26  ;;  %190 = vst [vmem:[%s329_s3 + $0x18] sm:$0xff] %v186_v27  ;;  %v194_v32 = vand.u32 2147483647, %v186_v27 }
  0xd6   :  { %v134_v34 = vpop.f32.mrf.mxu0  ;;  %v175_v35 = vpop.f32.mrf.mxu1 }
  0xd7   :  { %v195_v36 = vmax.f32.f32 %v191_v30, %v192_v31  ;;  %v196_v37 = vmax.f32.f32 %v193_v33, %v194_v32 }
  0xd9   :  { %v197_v38 = vmax.f32.f32 %v195_v36, %v196_v37 }
  0xdb   :  { %198 = vmax.xlane.f32.xlu0 %v197_v38 }
 0x164   :  { %v199_v39 = vpop.xlane.xlu0 %198 }
 0x165   :  { %v200_v40 = vrot.slane %v199_v39, 4 }
 0x167   :  { %v201_v41 = vmax.f32 %v199_v39, %v200_v40 }
 0x169   :  { %v202_v42 = vrot.slane %v201_v41, 2 }
 0x16b   :  { %v203_v43 = vmax.f32 %v201_v41, %v202_v42 }
 0x16d   :  { %v204_v44 = vrot.slane %v203_v43, 1 }
 0x16f   :  { %v205_v45 = vmax.f32 %v203_v43, %v204_v44 }
 0x171   :  { %206 = vst [vmem:[%s330_s4] sm:$0xff] %v205_v45 }

</bundles_post_ra>
